<compile_context>
chip_gen: v7x
topology: tpu7x:2x2x1
jax: 0.10.0
libtpu: 0.0.40
codegen_flags: <defaults>
</compile_context>

<pallas_src>
import jax
import jax.numpy as jnp
from jax import lax
from jax.experimental import pallas as pl
from jax.experimental.pallas import tpu as pltpu

MAX_BLOCK_ROWS = 512            # cap on output rows per grid step
VMEM_BUDGET_BYTES = 16 << 20    # conservative per-step VMEM budget


def _embed_kernel(idx_ref, table_ref, out_ref):
    # idx_ref:   VMEM, (BLOCK_ROWS, 1) int32   (this block's token ids)
    # table_ref: VMEM, (V, D)                  (full embedding table, resident)
    # out_ref:   VMEM, (BLOCK_ROWS, D)         (this block of the output)
    ids = idx_ref[...]                                    # (BLOCK_ROWS, 1)
    rows = ids.shape[0]
    vocab = table_ref.shape[0]

    # One-hot gather on the MXU: (rows, V) @ (V, D) -> (rows, D).
    iota = lax.broadcasted_iota(jnp.int32, (rows, vocab), 1)
    onehot = (iota == ids).astype(table_ref.dtype)
    out_ref[...] = jnp.dot(
        onehot, table_ref[...], preferred_element_type=jnp.float32
    ).astype(out_ref.dtype)


def _choose_block_rows(n, vocab, dim, itemsize):
    """Sublane-aligned tile height that fits the VMEM budget (single step if possible)."""
    # Rough per-step VMEM: resident table (double-buffered by the pipeline),
    # double-buffered output tile, double-buffered id tile, one-hot + f32 acc.
    table_bytes = 2 * vocab * dim * itemsize
    per_row = 2 * dim * itemsize + vocab * itemsize + dim * 4 + 2 * 4
    budget_rows = (VMEM_BUDGET_BYTES - table_bytes) // max(per_row, 1)
    cap = int(min(MAX_BLOCK_ROWS, max(8, budget_rows)))
    cap = max(8, (cap // 8) * 8)
    if n <= cap:
        return max(8, ((n + 7) // 8) * 8)
    return cap


def time_embeddings(time, table):
    """time: (B, S) int ids, table: (time_size, D) -> (B, S, D) in table.dtype."""
    B, S = time.shape
    V, D = table.shape
    N = B * S

    block_rows = _choose_block_rows(N, V, D, table.dtype.itemsize)
    n_pad = pl.cdiv(N, block_rows) * block_rows

    flat = time.reshape(N).astype(jnp.int32)
    if n_pad != N:
        flat = jnp.pad(flat, (0, n_pad - N))  # pad with id 0 (valid row)
    ids2d = flat.reshape(n_pad, 1)

    grid_spec = pl.GridSpec(
        grid=(n_pad // block_rows,),
        in_specs=[
            # this block's ids as a VMEM tile
            pl.BlockSpec((block_rows, 1), lambda i: (i, 0)),
            # full embedding table, constant block index -> stays resident
            pl.BlockSpec((V, D), lambda i: (0, 0)),
        ],
        out_specs=pl.BlockSpec((block_rows, D), lambda i: (i, 0)),
    )

    itemsize = table.dtype.itemsize
    cost = pl.CostEstimate(
        flops=2 * n_pad * V * D,
        transcendentals=0,
        bytes_accessed=n_pad * 4 + V * D * itemsize + n_pad * D * itemsize,
    )

    out_flat = pl.pallas_call(
        _embed_kernel,
        out_shape=jax.ShapeDtypeStruct((n_pad, D), table.dtype),
        grid_spec=grid_spec,
        compiler_params=pltpu.CompilerParams(
            dimension_semantics=("parallel",)
        ),
        cost_estimate=cost,
    )(ids2d, table)

    if n_pad != N:
        out_flat = out_flat[:N]
    return out_flat.reshape(B, S, D)


if __name__ == "__main__":
    time_size = 32
    time_embed_dim = 128
    B, S = 2, 8

    key = jax.random.PRNGKey(0)
    k_table, k_idx = jax.random.split(key)

    # Deterministic parameter init (matches nn.Embedding default: N(0, 1)).
    table = jax.random.normal(k_table, (time_size, time_embed_dim), dtype=jnp.float32)
    time_ids = jax.random.randint(k_idx, (B, S), 0, time_size, dtype=jnp.int32)

    out = time_embeddings(time_ids, table)
    out = jax.block_until_ready(out)

    # Reference check against a plain JAX gather.
    ref = table[time_ids]
    assert out.shape == (B, S, time_embed_dim)
    assert jnp.allclose(out, ref), "mismatch vs reference embedding lookup"

    print("KERNEL_OK")
</pallas_src>

<mosaic_0001>
module attributes {stable_mosaic.version = 11 : i64} {
  func.func @_embed_kernel(%arg0: i32, %arg1: memref<16x1xi32, #tpu.memory_space<vmem>>, %arg2: memref<32x128xf32, #tpu.memory_space<vmem>>, %arg3: memref<16x128xf32, #tpu.memory_space<vmem>>) attributes {dimension_semantics = [#tpu.dimension_semantics<parallel>], iteration_bounds = array<i64: 1>, scalar_prefetch = 0 : i64, scratch_operands = 0 : i64, tpu.core_type = #tpu.core_type<tc>, window_params = [{transform_indices = @transform_0, window_bounds = array<i64: 16, 1>}, {pipeline_mode = #tpu.pipeline_mode<synchronous>, transform_indices = @transform_1, window_bounds = array<i64: 32, 128>}, {transform_indices = @transform_2, window_bounds = array<i64: 16, 128>}]} {
    %c0 = arith.constant 0 : index
    %c0_0 = arith.constant 0 : index
    %0 = vector.load %arg1[%c0, %c0_0] : memref<16x1xi32, #tpu.memory_space<vmem>>, vector<16x1xi32>
    %1 = tpu.iota {dimensions = array<i32: 1>} : vector<16x32xi32>
    %2 = vector.broadcast %0 : vector<16x1xi32> to vector<16x32xi32>
    %3 = arith.cmpi eq, %1, %2 : vector<16x32xi32>
    %4 = arith.extui %3 : vector<16x32xi1> to vector<16x32xi32>
    %5 = arith.sitofp %4 : vector<16x32xi32> to vector<16x32xf32>
    %c0_1 = arith.constant 0 : index
    %c0_2 = arith.constant 0 : index
    %6 = vector.load %arg2[%c0_1, %c0_2] : memref<32x128xf32, #tpu.memory_space<vmem>>, vector<32x128xf32>
    %cst = arith.constant dense<0.000000e+00> : vector<16x128xf32>
    %7 = tpu.matmul %5, %6, %cst {dimension_numbers = #tpu.dot_dimension_numbers<[1], [0], [0], [1], [0, 0, 1, 1], [], []>} : vector<16x32xf32>, vector<32x128xf32>, vector<16x128xf32> -> vector<16x128xf32>
    %c0_3 = arith.constant 0 : index
    %c0_4 = arith.constant 0 : index
    %8 = vector.load %arg3[%c0_3, %c0_4] : memref<16x128xf32, #tpu.memory_space<vmem>>, vector<16x128xf32>
    tpu.vector_store %arg3[%c0_3, %c0_4], %7 {strides = array<i32>} : memref<16x128xf32, #tpu.memory_space<vmem>>, vector<16x128xf32>,
    return
  }
  func.func @transform_0(%arg0: i32) -> (i32, i32) {
    %c0_i32 = arith.constant 0 : i32
    %c0_i32_0 = arith.constant 0 : i32
    return %arg0, %c0_i32 : i32, i32
  }
  func.func @transform_1(%arg0: i32) -> (i32, i32) {
    %c0_i32 = arith.constant 0 : i32
    %c0_i32_0 = arith.constant 0 : i32
    %c0_i32_1 = arith.constant 0 : i32
    return %c0_i32, %c0_i32_0 : i32, i32
  }
  func.func @transform_2(%arg0: i32) -> (i32, i32) {
    %c0_i32 = arith.constant 0 : i32
    %c0_i32_0 = arith.constant 0 : i32
    return %arg0, %c0_i32 : i32, i32
  }
}

</mosaic_0001>

<bundles_post_ra>
// kernel: tpu_custom_call.1
= control target key start
LH: loop header
LB: loop body
LE: loop exit
PB: predicated region body
PF: predicated region fallthrough
CT: control target
= control target key end

     0   :  { %7 = vsyncpa [#allocation3], 0  ;;  %s288_s0 = inlined_call_operand.vmem [shape: s32[16,1], index: 0, kind: input, shape index: {}]   ;;  %s289_s1 = inlined_call_operand.hbm [shape: f32[32,128], index: 1, kind: input, shape index: {}]   ;;  %s290_s2 = inlined_call_operand.hbm [shape: f32[16,128], index: 2, kind: output, shape index: {}]  }
   0x1   :  { %8 = vsyncpa [#allocation4], 0  ;;  %s231_s9 = smov [#allocation2]   ;;  %s183_s13 = scalar_lea.hbm %s289_s1, 512 }
   0x2   :  { %s16_s10 = sshll.u32 %s231_s9, 4  ;;  %p184_p0 = scmp.ne.s32.totalorder %s289_s1, %s183_s13  ;;  %s17_s10 = int_to_ptr.vmem [resolvable:$true] %s16_s10 }
   0x3   :  { %p187_p1 = scmp.lt.u32.totalorder %s183_s13, %s289_s1 }
   0x5   :  { %p189_p2 = pnand %p187_p1, %p184_p0 }
   0x7   :  { %192 = shalt.err (!%p189_p2)
}
   0x8   :  { %s193_s18 = scalar_lea.vmem %s17_s10, 512  ;;  %p198_p4 = scmp.lt.s32.totalorder %s17_s10, %s17_s10 }
   0x9   :  { %p194_p3 = scmp.ne.s32.totalorder %s17_s10, %s193_s18  ;;  %p199_p5 = scmp.lt.s32.totalorder %s193_s18, %s193_s18 }
   0xb   :  { %p200_p6 = por %p199_p5, %p198_p4 }
   0xd   :  { %p201_p7 = pnand %p200_p6, %p194_p3 }
   0xf   :  { %204 = shalt.err (!%p201_p7)
}
  0x10   :  { %s232_s19 = smov 128   ;;  %s233_s20 = smov 8  }
  0x11   :  { %22 = dma.hbm_to_vmem [thread:$0]  %s289_s1, 512, %s17_s10, [#allocation3], %s232_s19, %s232_s19, %s233_s20  }
  0x12   :  { %227 = dma.done.wait [#allocation3], 512  }
  0x13   :  { %228 = vsyncadd [#allocation3], 4294966784  ;;  %v234_v0 = vmov 0   ;;  %v26_v1 = vld [vmem:[%s288_s0] sm:$0xff]  ;;  %v43_v3 = vld [vmem:[#allocation2 + $0x8] sm:$0xff]  ;;  %v28_v9 = vlaneseq  ;;  %vm46_vm0 = vcmask 261120  }
  0x14   :  { %182 = vset.pattern.permute.xlu0 %v234_v0  ;;  %v42_v2 = vld [vmem:[#allocation2] sm:$0xff]  ;;  %v44_v4 = vld [vmem:[#allocation2 + $0x10] sm:$0xff]  ;;  %v45_v5 = vld [vmem:[#allocation2 + $0x18] sm:$0xff]  ;;  %v235_v12 = vmov 0.0  }
  0x15   :  { %31 = vperm.xlu0 %182, %v26_v1   ;;  %v27_v6 = vld [vmem:[%s288_s0 + $0x8] sm:$0xff]  ;;  %v168_v7 = vpack.c.bf16 %v43_v3, %v42_v2  ;;  %v172_v8 = vpack.c.bf16 %v45_v5, %v44_v4  ;;  %v29_v10 = vand.u32 127, %v28_v9  ;;  %s236_s0 = smov [#allocation5]  }
  0x16   :  { %s135_s1 = sshll.u32 %s236_s0, 4  ;;  %s136_s1 = int_to_ptr.vmem [resolvable:$true] %s135_s1 }
  0x17   :  { %169 = vmatprep.subr.bf16.mxu0 %v168_v7  ;;  %s205_s27 = scalar_lea.vmem %s136_s1, 256  ;;  %p210_p9 = scmp.lt.s32.totalorder %s136_s1, %s136_s1 }
  0x18   :  { %171 = vmatpush3.bf16.msra.mxu0 %v168_v7  ;;  %p206_p8 = scmp.ne.s32.totalorder %s136_s1, %s205_s27  ;;  %p211_p10 = scmp.lt.s32.totalorder %s205_s27, %s205_s27 }
  0x19   :  { %34 = vperm.xlu0 %182, %v27_v6   ;;  %173 = vmatprep.subr.bf16.mxu0 %v172_v8 }
  0x1a   :  { %p212_p11 = por %p211_p10, %p210_p9 }
  0x1c   :  { %175 = vmatpush3.bf16.msra.mxu0 %v172_v8  ;;  %p213_p12 = pnand %p212_p11, %p206_p8 }
  0x94   :  { %v32_v11 = vpop.permute.xlu0 %31 }
  0x95   :  { %vm36_vm1 = vcmp.eq.s32.totalorder %v29_v10, %v32_v11 }
  0x96   :  { %v147_v13 = vsel %vm36_vm1, 1.0, %v235_v12 }
  0x97   :  { %165 = vmatprep.mubr.msk.f32.mxu0 %vm46_vm0, %v147_v13 }
  0x98   :  { %v35_v14 = vpop.permute.xlu0 %34 }
  0x99   :  { %vm37_vm2 = vcmp.eq.s32.totalorder %v29_v10, %v35_v14 }
  0x9a   :  { %v148_v15 = vsel %vm37_vm2, 1.0, %v235_v12 }
  0x9b   :  { %166 = vmatmul.mubr.msk.f32.vlgmr.msra.gmra.mrb[0].mxu0 %vm46_vm0, %v148_v15 }
 0x16e   :  { %v167_v16 = vpop.f32.mrb[0].mxu0 }
 0x16f   :  { %129 = vst [vmem:[#allocation5 + $0x8] sm:$0xff] %v167_v16  ;;  %v119_v17 = vpop.f32.mrb[1].mxu0 }
 0x170   :  { %128 = vst [vmem:[#allocation5] sm:$0xff] %v119_v17 }
 0x171   :  { %216 = shalt.err (!%p213_p12)
}
 0x172   :  { %s217_s30 = scalar_lea.hbm %s290_s2, 256 }
 0x173   :  { %p218_p13 = scmp.ne.s32.totalorder %s290_s2, %s217_s30  ;;  %p221_p0 = scmp.lt.u32.totalorder %s217_s30, %s290_s2 }
 0x175   :  { %p223_p1 = pnand %p221_p0, %p218_p13 }
 0x177   :  { %226 = shalt.err (!%p223_p1)
}
 0x178   :  { %141 = dma.vmem_to_hbm [thread:$0]  %s136_s1, 256, %s290_s2, [#allocation4], %s232_s19, %s232_s19, %s233_s20  }
 0x179   :  { %229 = dma.done.wait [#allocation4], 256  }
 0x17a   :  { %230 = vsyncadd [#allocation4], 4294967040 }
 0x17b   :  { %145 = vsyncpa [#allocation3], 1 }
 0x17c   :  { %146 = vsyncpa [#allocation4], 1 }

</bundles_post_ra>
